<compile_context>
chip_gen: v5e
topology: v5e:2x2
jax: 0.10.0
libtpu: 0.0.40
codegen_flags: <defaults>
</compile_context>

<pallas_src>
import jax
import jax.numpy as jnp
from jax.experimental import pallas as pl
from jax.experimental.pallas import tpu as pltpu

# Small synthetic shapes consistent with the module's forward.
B, S, D, FF, VOCAB = 2, 8, 32, 64, 50
BS = B * S          # flattened batch*sequence rows
B_PAD = 8           # sublane-padded pooled-output rows
OUT_W = 128         # lane-dense output width (>= 128)


def _layernorm(x, g, b, eps=1e-5):
    mu = jnp.mean(x, axis=-1, keepdims=True)
    var = jnp.mean((x - mu) ** 2, axis=-1, keepdims=True)
    return (x - mu) * jax.lax.rsqrt(var + eps) * g + b


# ----------------------------------------------------------------------------
# Fused kernel: encoder layer + masked mean pooling + L2 normalize.
# ----------------------------------------------------------------------------
def fused_text_encoder_kernel(x_ref, bias_ref, pool_ref,
                              wqkv_ref, bqkv_ref, wo_ref,
                              w1_ref, b1_ref, w2_ref, vecs_ref,
                              out_ref):
    f32 = jnp.float32
    x = x_ref[...]                                   # (BS, D) f32
    vecs = vecs_ref[...]                             # (6, D): bo,g1,be1,b2,g2,be2
    bo, g1, be1, b2, g2, be2 = [vecs[i:i + 1, :] for i in range(6)]

    # --- self-attention (single head), packed QKV matmul ---------------------
    qkv = jnp.dot(x, wqkv_ref[...], preferred_element_type=f32) + bqkv_ref[...]
    q = qkv[:, 0 * D:1 * D]
    k = qkv[:, 1 * D:2 * D]
    v = qkv[:, 2 * D:3 * D]

    scale = 1.0 / (float(D) ** 0.5)
    # Contract the last axes of q and k directly (no explicit transpose).
    scores = jax.lax.dot_general(
        q, k, (((1,), (1,)), ((), ())),
        preferred_element_type=f32) * scale + bias_ref[...]       # (BS, BS)

    scores = scores - jnp.max(scores, axis=-1, keepdims=True)
    p = jnp.exp(scores)
    p = p * pl.reciprocal(jnp.sum(p, axis=-1, keepdims=True), approx=True)

    attn = jnp.dot(p, v, preferred_element_type=f32)              # (BS, D)
    attn = jnp.dot(attn, wo_ref[...], preferred_element_type=f32) + bo

    h1 = _layernorm(x + attn, g1, be1)                            # norm1
    ff = jnp.maximum(
        jnp.dot(h1, w1_ref[...], preferred_element_type=f32) + b1_ref[...], 0.0)
    ff = jnp.dot(ff, w2_ref[...], preferred_element_type=f32) + b2
    h2 = _layernorm(h1 + ff, g2, be2)                             # norm2

    # --- masked mean pooling as one matmul, then F.normalize(p=2, dim=1) -----
    pool = pool_ref[...]                                          # (B_PAD, BS)
    summed = jnp.dot(pool, h2, preferred_element_type=f32)        # (B_PAD, D)
    counts = jnp.sum(pool, axis=-1, keepdims=True)                # (B_PAD, 1)
    mean = summed * pl.reciprocal(jnp.maximum(counts, 1e-9), approx=True)

    norm_sq = jnp.sum(mean * mean, axis=-1, keepdims=True)
    normed = mean * jax.lax.rsqrt(jnp.maximum(norm_sq, 1e-24))    # eps=1e-12

    # Lane-dense (8, 128) output tile; wrapper slices back to (B, D).
    out_ref[...] = jnp.concatenate(
        [normed, jnp.zeros((B_PAD, OUT_W - D), f32)], axis=-1).astype(out_ref.dtype)


# ----------------------------------------------------------------------------
# Parameters (packed layout).
# ----------------------------------------------------------------------------
def make_params(key):
    ks = jax.random.split(key, 18)
    s = 0.05

    def mat(k, shape):
        return jax.random.normal(k, shape, jnp.float32) * s

    def vec(k, n, base=0.0):
        return base + jax.random.normal(k, (1, n), jnp.float32) * s

    wq, wk, wv = mat(ks[1], (D, D)), mat(ks[2], (D, D)), mat(ks[3], (D, D))
    bq, bk, bv = vec(ks[4], D), vec(ks[5], D), vec(ks[6], D)
    bo = vec(ks[7], D)
    g1, be1 = vec(ks[8], D, base=1.0), vec(ks[9], D)
    b1 = vec(ks[10], FF)
    b2 = vec(ks[11], D)
    g2, be2 = vec(ks[12], D, base=1.0), vec(ks[13], D)

    return {
        "embedding": mat(ks[0], (VOCAB, D)),
        "w_qkv": jnp.concatenate([wq, wk, wv], axis=1),            # (D, 3D)
        "b_qkv": jnp.concatenate([bq, bk, bv], axis=1),            # (1, 3D)
        "wo": mat(ks[14], (D, D)),
        "w1": mat(ks[15], (D, FF)),
        "b1": b1,
        "w2": mat(ks[16], (FF, D)),
        # rows: [bo, gamma1, beta1, b2, gamma2, beta2]
        "vecs_d": jnp.concatenate([bo, g1, be1, b2, g2, be2], axis=0),  # (6, D)
    }


# ----------------------------------------------------------------------------
# Wrapper
# ----------------------------------------------------------------------------
def _full(shape):
    return pl.BlockSpec(shape, lambda *_: (0,) * len(shape))


@jax.jit
def text_encoder_forward(input_ids, attention_mask, params):
    # Glue: embedding lookup (pure gather) + mask preprocessing in plain JAX.
    emb = params["embedding"][input_ids]                           # (B, S, D)
    x2d = emb.reshape(BS, D).astype(jnp.float32)
    mask_f = attention_mask.astype(jnp.float32)                    # (B, S)
    mask_flat = mask_f.reshape(BS)

    # Block-diagonal key-padding bias for the flattened (BS, BS) attention.
    batch_of = jnp.arange(BS, dtype=jnp.int32) // S
    same_batch = batch_of[:, None] == batch_of[None, :]
    key_valid = mask_flat[None, :] > 0.5
    attn_bias = jnp.where(same_batch & key_valid, 0.0, -1e9).astype(jnp.float32)

    # Pooling matrix: pool_mat[b, i] = mask[b, i % S] if i // S == b else 0.
    one_hot = (jnp.arange(B_PAD, dtype=jnp.int32)[:, None]
               == batch_of[None, :]).astype(jnp.float32)           # (B_PAD, BS)
    pool_mat = one_hot * mask_flat[None, :]

    out_pad = pl.pallas_call(
        fused_text_encoder_kernel,
        out_shape=jax.ShapeDtypeStruct((B_PAD, OUT_W), jnp.float32),
        grid=(1,),
        in_specs=[
            _full((BS, D)),                      # x (flattened activations)
            _full((BS, BS)),                     # block-diagonal attention bias
            _full((B_PAD, BS)),                  # masked pooling matrix
            _full((D, 3 * D)), _full((1, 3 * D)),  # packed Wqkv, bqkv
            _full((D, D)),                       # Wo
            _full((D, FF)), _full((1, FF)),      # FFN linear1
            _full((FF, D)),                      # FFN linear2
            _full((6, D)),                       # bo, g1, be1, b2, g2, be2
        ],
        out_specs=_full((B_PAD, OUT_W)),
        compiler_params=pltpu.CompilerParams(
            dimension_semantics=("arbitrary",)),
    )(x2d, attn_bias, pool_mat,
      params["w_qkv"], params["b_qkv"], params["wo"],
      params["w1"], params["b1"], params["w2"], params["vecs_d"])

    return out_pad[:B, :D]


# ----------------------------------------------------------------------------
# Pure-JAX reference (mirrors the PyTorch semantics) for validation.
# ----------------------------------------------------------------------------
def reference_forward(input_ids, attention_mask, p):
    x = p["embedding"][input_ids].astype(jnp.float32)              # (B, S, D)
    mask = attention_mask.astype(jnp.float32)                      # (B, S)
    wq, wk, wv = [p["w_qkv"][:, i * D:(i + 1) * D] for i in range(3)]
    bq, bk, bv = [p["b_qkv"][:, i * D:(i + 1) * D] for i in range(3)]
    bo, g1, be1, b2, g2, be2 = [p["vecs_d"][i:i + 1, :] for i in range(6)]

    q = x @ wq + bq
    k = x @ wk + bk
    v = x @ wv + bv
    scores = jnp.einsum("bqd,bkd->bqk", q, k) / (float(D) ** 0.5)
    scores = scores + (mask[:, None, :] - 1.0) * 1e9
    pmat = jax.nn.softmax(scores, axis=-1)
    attn = jnp.einsum("bqk,bkd->bqd", pmat, v) @ p["wo"] + bo

    h1 = _layernorm(x + attn, g1, be1)
    ff = jax.nn.relu(h1 @ p["w1"] + p["b1"]) @ p["w2"] + b2
    h2 = _layernorm(h1 + ff, g2, be2)

    summed = jnp.sum(h2 * mask[:, :, None], axis=1)                # (B, D)
    counts = jnp.maximum(jnp.sum(mask, axis=1, keepdims=True), 1e-9)
    mean = summed / counts
    norm = jnp.maximum(jnp.sqrt(jnp.sum(mean * mean, axis=1, keepdims=True)), 1e-12)
    return mean / norm


if __name__ == "__main__":
    key = jax.random.PRNGKey(0)
    k_ids, k_params = jax.random.split(key)

    input_ids = jax.random.randint(k_ids, (B, S), 0, VOCAB, dtype=jnp.int32)
    # Deterministic per-example valid lengths (padding at the tail).
    lengths = jnp.array([S, S - 3], dtype=jnp.int32)
    attention_mask = (jnp.arange(S)[None, :] < lengths[:, None]).astype(jnp.int32)

    params = make_params(k_params)

    out = text_encoder_forward(input_ids, attention_mask, params)
    out = jax.block_until_ready(out)
    assert out.shape == (B, D)

    # Rows should be (approximately) unit L2 norm (F.normalize).
    norms = jnp.sqrt(jnp.sum(out * out, axis=1))
    assert bool(jnp.all(jnp.abs(norms - 1.0) < 1e-3))

    # Loose end-to-end check vs. a pure-JAX reference (approx reciprocal in the
    # kernel contributes only ~1e-4 relative noise; tolerance is generous).
    ref = reference_forward(input_ids, attention_mask, params)
    assert bool(jnp.max(jnp.abs(out - ref)) < 1e-2)

    print("KERNEL_OK")
</pallas_src>

<mosaic_0001>
module attributes {stable_mosaic.version = 11 : i64} {
  func.func @fused_text_encoder_kernel(%arg0: i32, %arg1: memref<16x32xf32, #tpu.memory_space<vmem>>, %arg2: memref<16x16xf32, #tpu.memory_space<vmem>>, %arg3: memref<8x16xf32, #tpu.memory_space<vmem>>, %arg4: memref<32x96xf32, #tpu.memory_space<vmem>>, %arg5: memref<1x96xf32, #tpu.memory_space<vmem>>, %arg6: memref<32x32xf32, #tpu.memory_space<vmem>>, %arg7: memref<32x64xf32, #tpu.memory_space<vmem>>, %arg8: memref<1x64xf32, #tpu.memory_space<vmem>>, %arg9: memref<64x32xf32, #tpu.memory_space<vmem>>, %arg10: memref<6x32xf32, #tpu.memory_space<vmem>>, %arg11: memref<8x128xf32, #tpu.memory_space<vmem>>) attributes {dimension_semantics = [#tpu.dimension_semantics<arbitrary>], iteration_bounds = array<i64: 1>, scalar_prefetch = 0 : i64, scratch_operands = 0 : i64, tpu.core_type = #tpu.core_type<tc>, window_params = [{pipeline_mode = #tpu.pipeline_mode<synchronous>, transform_indices = @transform_0, window_bounds = array<i64: 16, 32>}, {pipeline_mode = #tpu.pipeline_mode<synchronous>, transform_indices = @transform_1, window_bounds = array<i64: 16, 16>}, {pipeline_mode = #tpu.pipeline_mode<synchronous>, transform_indices = @transform_2, window_bounds = array<i64: 8, 16>}, {pipeline_mode = #tpu.pipeline_mode<synchronous>, transform_indices = @transform_3, window_bounds = array<i64: 32, 96>}, {pipeline_mode = #tpu.pipeline_mode<synchronous>, transform_indices = @transform_4, window_bounds = array<i64: 1, 96>}, {pipeline_mode = #tpu.pipeline_mode<synchronous>, transform_indices = @transform_5, window_bounds = array<i64: 32, 32>}, {pipeline_mode = #tpu.pipeline_mode<synchronous>, transform_indices = @transform_6, window_bounds = array<i64: 32, 64>}, {pipeline_mode = #tpu.pipeline_mode<synchronous>, transform_indices = @transform_7, window_bounds = array<i64: 1, 64>}, {pipeline_mode = #tpu.pipeline_mode<synchronous>, transform_indices = @transform_8, window_bounds = array<i64: 64, 32>}, {pipeline_mode = #tpu.pipeline_mode<synchronous>, transform_indices = @transform_9, window_bounds = array<i64: 6, 32>}, {pipeline_mode = #tpu.pipeline_mode<synchronous>, transform_indices = @transform_10, window_bounds = array<i64: 8, 128>}]} {
    %c0 = arith.constant 0 : index
    %c0_0 = arith.constant 0 : index
    %0 = vector.load %arg1[%c0, %c0_0] : memref<16x32xf32, #tpu.memory_space<vmem>>, vector<16x32xf32>
    %c0_1 = arith.constant 0 : index
    %c0_2 = arith.constant 0 : index
    %1 = vector.load %arg10[%c0_1, %c0_2] : memref<6x32xf32, #tpu.memory_space<vmem>>, vector<6x32xf32>
    %2 = vector.extract_strided_slice %1 {offsets = [0, 0], sizes = [1, 32], strides = [1, 1]} : vector<6x32xf32> to vector<1x32xf32>
    %3 = vector.extract_strided_slice %1 {offsets = [1, 0], sizes = [1, 32], strides = [1, 1]} : vector<6x32xf32> to vector<1x32xf32>
    %4 = vector.extract_strided_slice %1 {offsets = [2, 0], sizes = [1, 32], strides = [1, 1]} : vector<6x32xf32> to vector<1x32xf32>
    %5 = vector.extract_strided_slice %1 {offsets = [3, 0], sizes = [1, 32], strides = [1, 1]} : vector<6x32xf32> to vector<1x32xf32>
    %6 = vector.extract_strided_slice %1 {offsets = [4, 0], sizes = [1, 32], strides = [1, 1]} : vector<6x32xf32> to vector<1x32xf32>
    %7 = vector.extract_strided_slice %1 {offsets = [5, 0], sizes = [1, 32], strides = [1, 1]} : vector<6x32xf32> to vector<1x32xf32>
    %c0_3 = arith.constant 0 : index
    %c0_4 = arith.constant 0 : index
    %8 = vector.load %arg4[%c0_3, %c0_4] : memref<32x96xf32, #tpu.memory_space<vmem>>, vector<32x96xf32>
    %cst = arith.constant dense<0.000000e+00> : vector<16x96xf32>
    %9 = tpu.matmul %0, %8, %cst {dimension_numbers = #tpu.dot_dimension_numbers<[1], [0], [0], [1], [0, 0, 1, 1], [], []>} : vector<16x32xf32>, vector<32x96xf32>, vector<16x96xf32> -> vector<16x96xf32>
    %c0_5 = arith.constant 0 : index
    %c0_6 = arith.constant 0 : index
    %10 = vector.load %arg5[%c0_5, %c0_6] : memref<1x96xf32, #tpu.memory_space<vmem>>, vector<1x96xf32>
    %11 = vector.broadcast %10 : vector<1x96xf32> to vector<16x96xf32>
    %12 = arith.addf %9, %11 : vector<16x96xf32>
    %13 = vector.extract_strided_slice %12 {offsets = [0, 0], sizes = [16, 32], strides = [1, 1]} : vector<16x96xf32> to vector<16x32xf32>
    %14 = vector.extract_strided_slice %12 {offsets = [0, 32], sizes = [16, 32], strides = [1, 1]} : vector<16x96xf32> to vector<16x32xf32>
    %15 = vector.extract_strided_slice %12 {offsets = [0, 64], sizes = [16, 32], strides = [1, 1]} : vector<16x96xf32> to vector<16x32xf32>
    %cst_7 = arith.constant dense<0.000000e+00> : vector<16x16xf32>
    %16 = tpu.matmul %13, %14, %cst_7 {dimension_numbers = #tpu.dot_dimension_numbers<[1], [1], [0], [0], [0, 0, 1, 0], [], []>} : vector<16x32xf32>, vector<16x32xf32>, vector<16x16xf32> -> vector<16x16xf32>
    %cst_8 = arith.constant 0.176776692 : f32
    %17 = vector.broadcast %cst_8 : f32 to vector<16x16xf32>
    %18 = arith.mulf %16, %17 : vector<16x16xf32>
    %c0_9 = arith.constant 0 : index
    %c0_10 = arith.constant 0 : index
    %19 = vector.load %arg2[%c0_9, %c0_10] : memref<16x16xf32, #tpu.memory_space<vmem>>, vector<16x16xf32>
    %20 = arith.addf %18, %19 : vector<16x16xf32>
    %cst_11 = arith.constant dense<0xFF800000> : vector<16xf32>
    %21 = vector.multi_reduction <maximumf>, %20, %cst_11 [1] : vector<16x16xf32> to vector<16xf32>
    %22 = vector.shape_cast %21 : vector<16xf32> to vector<16x1xf32>
    %23 = vector.broadcast %22 : vector<16x1xf32> to vector<16x16xf32>
    %24 = arith.subf %20, %23 : vector<16x16xf32>
    %25 = math.exp %24 : vector<16x16xf32>
    %cst_12 = arith.constant dense<0.000000e+00> : vector<16xf32>
    %26 = vector.multi_reduction <add>, %25, %cst_12 [1] : vector<16x16xf32> to vector<16xf32>
    %27 = vector.shape_cast %26 : vector<16xf32> to vector<16x1xf32>
    %28 = tpu.reciprocal %27 {approx = true} : vector<16x1xf32> -> vector<16x1xf32>
    %29 = vector.broadcast %28 : vector<16x1xf32> to vector<16x16xf32>
    %30 = arith.mulf %25, %29 : vector<16x16xf32>
    %cst_13 = arith.constant dense<0.000000e+00> : vector<16x32xf32>
    %31 = tpu.matmul %30, %15, %cst_13 {dimension_numbers = #tpu.dot_dimension_numbers<[1], [0], [0], [1], [0, 0, 1, 1], [], []>} : vector<16x16xf32>, vector<16x32xf32>, vector<16x32xf32> -> vector<16x32xf32>
    %c0_14 = arith.constant 0 : index
    %c0_15 = arith.constant 0 : index
    %32 = vector.load %arg6[%c0_14, %c0_15] : memref<32x32xf32, #tpu.memory_space<vmem>>, vector<32x32xf32>
    %cst_16 = arith.constant dense<0.000000e+00> : vector<16x32xf32>
    %33 = tpu.matmul %31, %32, %cst_16 {dimension_numbers = #tpu.dot_dimension_numbers<[1], [0], [0], [1], [0, 0, 1, 1], [], []>} : vector<16x32xf32>, vector<32x32xf32>, vector<16x32xf32> -> vector<16x32xf32>
    %34 = vector.broadcast %2 : vector<1x32xf32> to vector<16x32xf32>
    %35 = arith.addf %33, %34 : vector<16x32xf32>
    %36 = arith.addf %0, %35 : vector<16x32xf32>
    %cst_17 = arith.constant dense<0.000000e+00> : vector<16xf32>
    %37 = vector.multi_reduction <add>, %36, %cst_17 [1] : vector<16x32xf32> to vector<16xf32>
    %38 = vector.shape_cast %37 : vector<16xf32> to vector<16x1xf32>
    %cst_18 = arith.constant 3.200000e+01 : f32
    %39 = vector.broadcast %cst_18 : f32 to vector<16x1xf32>
    %40 = arith.divf %38, %39 : vector<16x1xf32>
    %41 = vector.broadcast %40 : vector<16x1xf32> to vector<16x32xf32>
    %42 = arith.subf %36, %41 : vector<16x32xf32>
    %43 = arith.mulf %42, %42 : vector<16x32xf32>
    %cst_19 = arith.constant dense<0.000000e+00> : vector<16xf32>
    %44 = vector.multi_reduction <add>, %43, %cst_19 [1] : vector<16x32xf32> to vector<16xf32>
    %45 = vector.shape_cast %44 : vector<16xf32> to vector<16x1xf32>
    %cst_20 = arith.constant 3.200000e+01 : f32
    %46 = vector.broadcast %cst_20 : f32 to vector<16x1xf32>
    %47 = arith.divf %45, %46 : vector<16x1xf32>
    %48 = vector.broadcast %40 : vector<16x1xf32> to vector<16x32xf32>
    %49 = arith.subf %36, %48 : vector<16x32xf32>
    %cst_21 = arith.constant 9.99999974E-6 : f32
    %50 = vector.broadcast %cst_21 : f32 to vector<16x1xf32>
    %51 = arith.addf %47, %50 : vector<16x1xf32>
    %52 = math.rsqrt %51 : vector<16x1xf32>
    %53 = vector.broadcast %52 : vector<16x1xf32> to vector<16x32xf32>
    %54 = arith.mulf %49, %53 : vector<16x32xf32>
    %55 = vector.broadcast %3 : vector<1x32xf32> to vector<16x32xf32>
    %56 = arith.mulf %54, %55 : vector<16x32xf32>
    %57 = vector.broadcast %4 : vector<1x32xf32> to vector<16x32xf32>
    %58 = arith.addf %56, %57 : vector<16x32xf32>
    %c0_22 = arith.constant 0 : index
    %c0_23 = arith.constant 0 : index
    %59 = vector.load %arg7[%c0_22, %c0_23] : memref<32x64xf32, #tpu.memory_space<vmem>>, vector<32x64xf32>
    %cst_24 = arith.constant dense<0.000000e+00> : vector<16x64xf32>
    %60 = tpu.matmul %58, %59, %cst_24 {dimension_numbers = #tpu.dot_dimension_numbers<[1], [0], [0], [1], [0, 0, 1, 1], [], []>} : vector<16x32xf32>, vector<32x64xf32>, vector<16x64xf32> -> vector<16x64xf32>
    %c0_25 = arith.constant 0 : index
    %c0_26 = arith.constant 0 : index
    %61 = vector.load %arg8[%c0_25, %c0_26] : memref<1x64xf32, #tpu.memory_space<vmem>>, vector<1x64xf32>
    %62 = vector.broadcast %61 : vector<1x64xf32> to vector<16x64xf32>
    %63 = arith.addf %60, %62 : vector<16x64xf32>
    %cst_27 = arith.constant 0.000000e+00 : f32
    %64 = vector.broadcast %cst_27 : f32 to vector<16x64xf32>
    %65 = arith.maximumf %63, %64 : vector<16x64xf32>
    %c0_28 = arith.constant 0 : index
    %c0_29 = arith.constant 0 : index
    %66 = vector.load %arg9[%c0_28, %c0_29] : memref<64x32xf32, #tpu.memory_space<vmem>>, vector<64x32xf32>
    %cst_30 = arith.constant dense<0.000000e+00> : vector<16x32xf32>
    %67 = tpu.matmul %65, %66, %cst_30 {dimension_numbers = #tpu.dot_dimension_numbers<[1], [0], [0], [1], [0, 0, 1, 1], [], []>} : vector<16x64xf32>, vector<64x32xf32>, vector<16x32xf32> -> vector<16x32xf32>
    %68 = vector.broadcast %5 : vector<1x32xf32> to vector<16x32xf32>
    %69 = arith.addf %67, %68 : vector<16x32xf32>
    %70 = arith.addf %58, %69 : vector<16x32xf32>
    %cst_31 = arith.constant dense<0.000000e+00> : vector<16xf32>
    %71 = vector.multi_reduction <add>, %70, %cst_31 [1] : vector<16x32xf32> to vector<16xf32>
    %72 = vector.shape_cast %71 : vector<16xf32> to vector<16x1xf32>
    %cst_32 = arith.constant 3.200000e+01 : f32
    %73 = vector.broadcast %cst_32 : f32 to vector<16x1xf32>
    %74 = arith.divf %72, %73 : vector<16x1xf32>
    %75 = vector.broadcast %74 : vector<16x1xf32> to vector<16x32xf32>
    %76 = arith.subf %70, %75 : vector<16x32xf32>
    %77 = arith.mulf %76, %76 : vector<16x32xf32>
    %cst_33 = arith.constant dense<0.000000e+00> : vector<16xf32>
    %78 = vector.multi_reduction <add>, %77, %cst_33 [1] : vector<16x32xf32> to vector<16xf32>
    %79 = vector.shape_cast %78 : vector<16xf32> to vector<16x1xf32>
    %cst_34 = arith.constant 3.200000e+01 : f32
    %80 = vector.broadcast %cst_34 : f32 to vector<16x1xf32>
    %81 = arith.divf %79, %80 : vector<16x1xf32>
    %82 = vector.broadcast %74 : vector<16x1xf32> to vector<16x32xf32>
    %83 = arith.subf %70, %82 : vector<16x32xf32>
    %cst_35 = arith.constant 9.99999974E-6 : f32
    %84 = vector.broadcast %cst_35 : f32 to vector<16x1xf32>
    %85 = arith.addf %81, %84 : vector<16x1xf32>
    %86 = math.rsqrt %85 : vector<16x1xf32>
    %87 = vector.broadcast %86 : vector<16x1xf32> to vector<16x32xf32>
    %88 = arith.mulf %83, %87 : vector<16x32xf32>
    %89 = vector.broadcast %6 : vector<1x32xf32> to vector<16x32xf32>
    %90 = arith.mulf %88, %89 : vector<16x32xf32>
    %91 = vector.broadcast %7 : vector<1x32xf32> to vector<16x32xf32>
    %92 = arith.addf %90, %91 : vector<16x32xf32>
    %c0_36 = arith.constant 0 : index
    %c0_37 = arith.constant 0 : index
    %93 = vector.load %arg3[%c0_36, %c0_37] : memref<8x16xf32, #tpu.memory_space<vmem>>, vector<8x16xf32>
    %cst_38 = arith.constant dense<0.000000e+00> : vector<8x32xf32>
    %94 = tpu.matmul %93, %92, %cst_38 {dimension_numbers = #tpu.dot_dimension_numbers<[1], [0], [0], [1], [0, 0, 1, 1], [], []>} : vector<8x16xf32>, vector<16x32xf32>, vector<8x32xf32> -> vector<8x32xf32>
    %cst_39 = arith.constant dense<0.000000e+00> : vector<8xf32>
    %95 = vector.multi_reduction <add>, %93, %cst_39 [1] : vector<8x16xf32> to vector<8xf32>
    %96 = vector.shape_cast %95 : vector<8xf32> to vector<8x1xf32>
    %cst_40 = arith.constant 9.99999971E-10 : f32
    %97 = vector.broadcast %cst_40 : f32 to vector<8x1xf32>
    %98 = arith.maximumf %96, %97 : vector<8x1xf32>
    %99 = tpu.reciprocal %98 {approx = true} : vector<8x1xf32> -> vector<8x1xf32>
    %100 = vector.broadcast %99 : vector<8x1xf32> to vector<8x32xf32>
    %101 = arith.mulf %94, %100 : vector<8x32xf32>
    %102 = arith.mulf %101, %101 : vector<8x32xf32>
    %cst_41 = arith.constant dense<0.000000e+00> : vector<8xf32>
    %103 = vector.multi_reduction <add>, %102, %cst_41 [1] : vector<8x32xf32> to vector<8xf32>
    %104 = vector.shape_cast %103 : vector<8xf32> to vector<8x1xf32>
    %cst_42 = arith.constant 1.000000e-24 : f32
    %105 = vector.broadcast %cst_42 : f32 to vector<8x1xf32>
    %106 = arith.maximumf %104, %105 : vector<8x1xf32>
    %107 = math.rsqrt %106 : vector<8x1xf32>
    %108 = vector.broadcast %107 : vector<8x1xf32> to vector<8x32xf32>
    %109 = arith.mulf %101, %108 : vector<8x32xf32>
    %cst_43 = arith.constant 0.000000e+00 : f32
    %110 = vector.broadcast %cst_43 : f32 to vector<8x96xf32>
    %111 = tpu.concatenate %109, %110 in 1 : vector<8x32xf32>, vector<8x96xf32> -> vector<8x128xf32>
    %c0_44 = arith.constant 0 : index
    %c0_45 = arith.constant 0 : index
    %112 = vector.load %arg11[%c0_44, %c0_45] : memref<8x128xf32, #tpu.memory_space<vmem>>, vector<8x128xf32>
    tpu.vector_store %arg11[%c0_44, %c0_45], %111 {strides = array<i32>} : memref<8x128xf32, #tpu.memory_space<vmem>>, vector<8x128xf32>,
    return
  }
  func.func @transform_0(%arg0: i32) -> (i32, i32) {
    %c0_i32 = arith.constant 0 : i32
    %c0_i32_0 = arith.constant 0 : i32
    %c0_i32_1 = arith.constant 0 : i32
    return %c0_i32, %c0_i32_0 : i32, i32
  }
  func.func @transform_1(%arg0: i32) -> (i32, i32) {
    %c0_i32 = arith.constant 0 : i32
    %c0_i32_0 = arith.constant 0 : i32
    %c0_i32_1 = arith.constant 0 : i32
    return %c0_i32, %c0_i32_0 : i32, i32
  }
  func.func @transform_2(%arg0: i32) -> (i32, i32) {
    %c0_i32 = arith.constant 0 : i32
    %c0_i32_0 = arith.constant 0 : i32
    %c0_i32_1 = arith.constant 0 : i32
    return %c0_i32, %c0_i32_0 : i32, i32
  }
  func.func @transform_3(%arg0: i32) -> (i32, i32) {
    %c0_i32 = arith.constant 0 : i32
    %c0_i32_0 = arith.constant 0 : i32
    %c0_i32_1 = arith.constant 0 : i32
    return %c0_i32, %c0_i32_0 : i32, i32
  }
  func.func @transform_4(%arg0: i32) -> (i32, i32) {
    %c0_i32 = arith.constant 0 : i32
    %c0_i32_0 = arith.constant 0 : i32
    %c0_i32_1 = arith.constant 0 : i32
    return %c0_i32, %c0_i32_0 : i32, i32
  }
  func.func @transform_5(%arg0: i32) -> (i32, i32) {
    %c0_i32 = arith.constant 0 : i32
    %c0_i32_0 = arith.constant 0 : i32
    %c0_i32_1 = arith.constant 0 : i32
    return %c0_i32, %c0_i32_0 : i32, i32
  }
  func.func @transform_6(%arg0: i32) -> (i32, i32) {
    %c0_i32 = arith.constant 0 : i32
    %c0_i32_0 = arith.constant 0 : i32
    %c0_i32_1 = arith.constant 0 : i32
    return %c0_i32, %c0_i32_0 : i32, i32
  }
  func.func @transform_7(%arg0: i32) -> (i32, i32) {
    %c0_i32 = arith.constant 0 : i32
    %c0_i32_0 = arith.constant 0 : i32
    %c0_i32_1 = arith.constant 0 : i32
    return %c0_i32, %c0_i32_0 : i32, i32
  }
  func.func @transform_8(%arg0: i32) -> (i32, i32) {
    %c0_i32 = arith.constant 0 : i32
    %c0_i32_0 = arith.constant 0 : i32
    %c0_i32_1 = arith.constant 0 : i32
    return %c0_i32, %c0_i32_0 : i32, i32
  }
  func.func @transform_9(%arg0: i32) -> (i32, i32) {
    %c0_i32 = arith.constant 0 : i32
    %c0_i32_0 = arith.constant 0 : i32
    %c0_i32_1 = arith.constant 0 : i32
    return %c0_i32, %c0_i32_0 : i32, i32
  }
  func.func @transform_10(%arg0: i32) -> (i32, i32) {
    %c0_i32 = arith.constant 0 : i32
    %c0_i32_0 = arith.constant 0 : i32
    %c0_i32_1 = arith.constant 0 : i32
    return %c0_i32, %c0_i32_0 : i32, i32
  }
}

</mosaic_0001>

<bundles_post_ra>
// kernel: text_encoder_forward.1
= control target key start
LH: loop header
LB: loop body
LE: loop exit
PB: predicated region body
PF: predicated region fallthrough
CT: control target
= control target key end

     0   :  { %vm46_vm0 = vcmask 261120   ;;  %s507_s26 = smov 96   ;;  %vm119_vm1 = vcmask 130048   ;;  %v509_v59 = vmov 32.0   ;;  %vm318_vm9 = vcmask 523264   ;;  %s711_s3 = inlined_call_operand.vmem [shape: f32[32,96], index: 3, kind: input, shape index: {}]   ;;  %s712_s4 = inlined_call_operand.vmem [shape: f32[1,96], index: 4, kind: input, shape index: {}]   ;;  %s713_s0 = inlined_call_operand.vmem [shape: f32[16,32], index: 0, kind: input, shape index: {}]   ;;  %s714_s1 = inlined_call_operand.vmem [shape: f32[16,16], index: 1, kind: input, shape index: {}]   ;;  %s715_s5 = inlined_call_operand.vmem [shape: f32[32,32], index: 5, kind: input, shape index: {}]   ;;  %s716_s9 = inlined_call_operand.vmem [shape: f32[6,32], index: 9, kind: input, shape index: {}]   ;;  %s717_s7 = inlined_call_operand.vmem [shape: f32[1,64], index: 7, kind: input, shape index: {}]   ;;  %s718_s6 = inlined_call_operand.vmem [shape: f32[32,64], index: 6, kind: input, shape index: {}]   ;;  %s719_s8 = inlined_call_operand.vmem [shape: f32[64,32], index: 8, kind: input, shape index: {}]   ;;  %s720_s2 = inlined_call_operand.vmem [shape: f32[8,16], index: 2, kind: input, shape index: {}]   ;;  %s721_s10 = inlined_call_operand.vmem [shape: f32[8,128], index: 10, kind: output, shape index: {}]  }
   0x1   :  { %v41_v0 = vld [vmem:[%s711_s3 + $0x18] sm:$0xff]  ;;  %v40_v1 = vld [vmem:[%s711_s3 + $0x10] sm:$0xff]  ;;  %v39_v2 = vld [vmem:[%s711_s3 + $0x8] sm:$0xff] }
   0x2   :  { %65 = vmatpush.msra.mxu0 %v41_v0  ;;  %v38_v3 = vld [vmem:[%s711_s3] sm:$0xff]  ;;  %v587_v5 = vld [vmem:[%s713_s0 + $0x8] sm:$0xff]  ;;  %v180_v34 = vld [vmem:[%s715_s5 + $0x18] sm:$0xff] }
   0x3   :  { %v580_v4 = vld [vmem:[%s713_s0] sm:$0xff]  ;;  %v116_v19 = vld [vmem:[%s714_s1 + $0x8] sm:$0xff]  ;;  %v179_v35 = vld [vmem:[%s715_s5 + $0x10] sm:$0xff]  ;;  %200 = vmatpush.msra.mxu3 %v180_v34 }
   0x4   :  { %66 = vmatpush.msra.mxu0 %v40_v1  ;;  %v483_v7 = vld [vmem:[%s712_s4] ss:$0 sm:$0xff]  ;;  %v178_v36 = vld [vmem:[%s715_s5 + $0x8] sm:$0xff] }
   0x5   :  { %v115_v14 = vld [vmem:[%s714_s1] sm:$0xff]  ;;  %s508_s1 = smov 64   ;;  %201 = vmatpush.msra.mxu3 %v179_v35 }
   0x6   :  { %67 = vmatpush.msra.mxu0 %v39_v2  ;;  %v177_v46 = vld [vmem:[%s715_s5] sm:$0xff] }
   0x7   :  { %202 = vmatpush.msra.mxu3 %v178_v36  ;;  %v627_v49 = vld [vmem:[%s716_s9] sm:$0x3f] }
   0x8   :  { %68 = vmatpush.msra.mxu0 %v38_v3  ;;  %v181_v50 = vperm.slane %v627_v49, 0  ;;  %v264_v35 = vperm.slane %v627_v49, 1 }
   0x9   :  { %452 = vmatmul.msk.f32.vlgmr.msra.gmra.mxu0 %vm46_vm0, %v580_v4  ;;  %203 = vmatpush.msra.mxu3 %v177_v46 }
  0x11   :  { %453 = vmatmul.msk.f32.gmra.mxu0 %vm46_vm0, %v587_v5 }
  0x86   :  { %v70_v6 = vpop.f32.mrf.mxu0 }
  0x87   :  { %v71_v10 = vadd.f32 %v483_v7, %v70_v6 }
  0x8e   :  { %v73_v8 = vpop.f32.mrf.mxu0 }
  0x8f   :  { %v74_v9 = vadd.f32 %v483_v7, %v73_v8 }
  0x91   :  { %80 = vrot.lane.b32.xlu0 %v74_v9, %s507_s26  ;;  %v478_v33 = vpack.i.bf16 %v71_v10, %v74_v9 }
  0x99   :  { %78 = vrot.lane.b32.xlu0 %v71_v10, %s507_s26 }
 0x103   :  { %v81_v11 = vpop.permute.xlu0 %80 }
 0x104   :  { %454 = vmatpush.xpose.msk.msra.mxu1 %vm46_vm0, %v81_v11 }
 0x10b   :  { %v79_v12 = vpop.permute.xlu0 %78 }
 0x10c   :  { %455 = vmatpush.xpose.msk.msra.mxu1 %vm46_vm0, %v79_v12  ;;  %v273_v12 = vld [vmem:[%s718_s6 + $0x18] sm:$0xff] }
 0x10f   :  { %456 = vmatmul.msk.f32.vlgmr.msra.gmra.mxu1 %vm46_vm0, %v71_v10 }
 0x117   :  { %457 = vmatmul.msk.f32.gmra.mxu1 %vm46_vm0, %v74_v9 }
 0x18c   :  { %v107_v13 = vpop.f32.mrf.mxu1 }
 0x18d   :  { %v113_v15 = vmul.f32 0.17677669, %v107_v13  ;;  %v272_v13 = vld [vmem:[%s718_s6 + $0x10] sm:$0xff] }
 0x18f   :  { %v117_v16 = vadd.f32 %v115_v14, %v113_v15  ;;  %v271_v14 = vld [vmem:[%s718_s6 + $0x8] sm:$0xff]  ;;  %v270_v15 = vld [vmem:[%s718_s6] sm:$0xff] }
 0x191   :  { %v120_v17 = vsel %vm119_vm1, %v117_v16, -inf }
 0x192   :  { %121 = vmax.xlane.f32.xlu1 %v120_v17 }
 0x194   :  { %v110_v18 = vpop.f32.mrf.mxu1 }
 0x195   :  { %v114_v20 = vmul.f32 0.17677669, %v110_v18 }
 0x197   :  { %v118_v21 = vadd.f32 %v116_v19, %v114_v20  ;;  %v316_v19 = vld [vmem:[%s719_s8 + $0x38] sm:$0xff]  ;;  %v315_v20 = vld [vmem:[%s719_s8 + $0x30] sm:$0xff] }
 0x198   :  { %333 = vmatpush.msrb.mxu0 %v316_v19  ;;  %467 = vmatpush.msrb.mxu3 %v316_v19  ;;  %v400_v19 = vld [vmem:[%s720_s2] sm:$0xff] }
 0x199   :  { %v123_v22 = vsel %vm119_vm1, %v118_v21, -inf }
 0x19a   :  { %124 = vmax.xlane.f32.xlu1 %v123_v22  ;;  %334 = vmatpush.msrb.mxu0 %v315_v20 }
 0x19b   :  { %468 = vmatpush.msrb.mxu3 %v315_v20  ;;  %v424_v20 = vsel %vm119_vm1, %v400_v19, 0.0 }
 0x205   :  { %v122_v23 = vpop.xlane.xlu1 %121 }
 0x206   :  { %v126_v24 = vsub.f32 %v117_v16, %v122_v23 }
 0x208   :  { %v128_v25 = vmul.f32 1.442695, %v126_v24  ;;  %v313_v24 = vld [vmem:[%s719_s8 + $0x20] sm:$0xff] }
 0x20a   :  { %485 = vpow2.f32 %v128_v25 }
 0x20d   :  { %v125_v26 = vpop.xlane.xlu1 %124 }
 0x20e   :  { %v127_v27 = vsub.f32 %v118_v21, %v125_v26  ;;  %v314_v21 = vld [vmem:[%s719_s8 + $0x28] sm:$0xff] }
 0x20f   :  { %335 = vmatpush.msrb.mxu0 %v314_v21  ;;  %469 = vmatpush.msrb.mxu3 %v314_v21 }
 0x210   :  { %v486_v28 = vpop.eup %485  ;;  %v130_v29 = vmul.f32 1.442695, %v127_v27  ;;  %v312_v27 = vld [vmem:[%s719_s8 + $0x18] sm:$0xff] }
 0x211   :  { %v132_v30 = vsel %vm119_vm1, %v486_v28, 0.0  ;;  %336 = vmatpush.msrb.mxu0 %v313_v24  ;;  %470 = vmatpush.msrb.mxu3 %v313_v24 }
 0x212   :  { %487 = vpow2.f32 %v130_v29  ;;  %133 = vadd.xlane.f32.xlu2 %v132_v30 }
 0x213   :  { %337 = vmatpush.msrb.mxu0 %v312_v27  ;;  %471 = vmatpush.msrb.mxu3 %v312_v27 }
 0x218   :  { %v488_v31 = vpop.eup %487 }
 0x219   :  { %v135_v32 = vsel %vm119_vm1, %v488_v31, 0.0 }
 0x21a   :  { %136 = vadd.xlane.f32.xlu0 %v135_v32 }
 0x22a   :  { %479 = vrot.lane.b32.xlu2 %v478_v33, %s508_s1 }
 0x285   :  { %v134_v37 = vpop.xlane.xlu2 %133 }
 0x286   :  { %489 = vrcp.f32 %v134_v37 }
 0x28c   :  { %v490_v40 = vpop.eup %489 }
 0x28d   :  { %v480_v38 = vpop.permute.xlu2 %479  ;;  %v137_v39 = vpop.xlane.xlu0 %136  ;;  %v140_v43 = vmul.f32 %v490_v40, %v486_v28 }
 0x28e   :  { %v481_v41 = vunpack.i.l.bf16 %v480_v38  ;;  %491 = vrcp.f32 %v137_v39  ;;  %v482_v42 = vunpack.i.h.bf16 %v480_v38  ;;  %v267_v39 = vperm.slane %v627_v49, 2 }
 0x28f   :  { %493 = vrcp.f32 %v509_v59 }
 0x290   :  { %168 = vmatpush.msra.mxu2 %v481_v41 }
 0x292   :  { %169 = vmatpush.msra.mxu2 %v482_v42 }
 0x293   :  { %458 = vmatmul.msk.f32.vlgmr.msra.gmra.mxu2 %vm119_vm1, %v140_v43 }
 0x294   :  { %v492_v44 = vpop.eup %491  ;;  %296 = vmatpush.msrb.mxu2 %v273_v12 }
 0x295   :  { %v141_v45 = vmul.f32 %v492_v44, %v488_v31  ;;  %v494_v60 = vpop.eup %493 }
 0x296   :  { %v220_v61 = vmul.f32 32.0, %v494_v60  ;;  %vm224_vm2 = vweird.f32 %v494_v60  ;;  %297 = vmatpush.msrb.mxu2 %v272_v13 }
 0x298   :  { %v221_v62 = vsub.f32 1.0, %v220_v61  ;;  %298 = vmatpush.msrb.mxu2 %v271_v14 }
 0x29a   :  { %v222_v63 = vmul.f32 %v494_v60, %v221_v62  ;;  %299 = vmatpush.msrb.mxu2 %v270_v15 }
 0x29b   :  { %459 = vmatmul.msk.f32.gmra.mxu2 %vm119_vm1, %v141_v45 }
 0x29c   :  { %v223_v0 = vadd.f32 %v494_v60, %v222_v63 }
 0x29e   :  { %v634_v1 = vsel %vm224_vm2, %v494_v60, %v223_v0  ;;  %v317_v60 = vperm.slane %v627_v49, 3 }
 0x316   :  { %v171_v47 = vpop.f32.mrf.mxu2 }
 0x317   :  { %460 = vmatmul.msk.f32.vlgmr.msra.gmra.mxu3 %vm46_vm0, %v171_v47 }
 0x31e   :  { %v174_v48 = vpop.f32.mrf.mxu2 }
 0x31f   :  { %461 = vmatmul.msk.f32.gmra.mxu3 %vm46_vm0, %v174_v48 }
 0x39a   :  { %v205_v51 = vpop.f32.mrf.mxu3 }
 0x39b   :  { %v206_v52 = vadd.f32 %v205_v51, %v181_v50  ;;  %v310_v51 = vld [vmem:[%s719_s8 + $0x8] sm:$0xff] }
 0x39d   :  { %v211_v53 = vadd.f32 %v206_v52, %v580_v4  ;;  %v309_v52 = vld [vmem:[%s719_s8] sm:$0xff] }
 0x39f   :  { %v213_v54 = vsel %vm46_vm0, %v211_v53, 0.0 }
 0x3a0   :  { %214 = vadd.xlane.f32.xlu1 %v213_v54 }
 0x3a2   :  { %v208_v55 = vpop.f32.mrf.mxu3 }
 0x3a3   :  { %v209_v56 = vadd.f32 %v208_v55, %v181_v50  ;;  %v311_v50 = vld [vmem:[%s719_s8 + $0x10] sm:$0xff] }
 0x3a4   :  { %338 = vmatpush.msrb.mxu0 %v311_v50  ;;  %472 = vmatpush.msrb.mxu3 %v311_v50 }
 0x3a5   :  { %v212_v57 = vadd.f32 %v209_v56, %v587_v5 }
 0x3a6   :  { %339 = vmatpush.msrb.mxu0 %v310_v51  ;;  %473 = vmatpush.msrb.mxu3 %v310_v51 }
 0x3a7   :  { %v216_v58 = vsel %vm46_vm0, %v212_v57, 0.0 }
 0x3a8   :  { %217 = vadd.xlane.f32.xlu1 %v216_v58  ;;  %340 = vmatpush.msrb.mxu0 %v309_v52 }
 0x3a9   :  { %474 = vmatpush.msrb.mxu3 %v309_v52 }
 0x413   :  { %v215_v2 = vpop.xlane.xlu1 %214 }
 0x414   :  { %v226_v3 = vmul.f32 %v634_v1, %v215_v2 }
 0x416   :  { %v228_v4 = vsub.f32 %v211_v53, %v226_v3  ;;  %v484_v53 = vld [vmem:[%s717_s7] ss:$0 sm:$0xff] }
 0x418   :  { %v230_v6 = vmul.f32 %v228_v4, %v228_v4 }
 0x41a   :  { %v232_v5 = vsel %vm46_vm0, %v230_v6, 0.0 }
 0x41b   :  { %233 = vadd.xlane.f32.xlu1 %v232_v5  ;;  %v218_v7 = vpop.xlane.xlu1 %217 }
 0x41c   :  { %v227_v8 = vmul.f32 %v634_v1, %v218_v7 }
 0x41e   :  { %v639_v9 = vsub.f32 %v212_v57, %v227_v8 }
 0x420   :  { %v231_v10 = vmul.f32 %v639_v9, %v639_v9 }
 0x422   :  { %v235_v11 = vsel %vm46_vm0, %v231_v10, 0.0 }
 0x423   :  { %236 = vadd.xlane.f32.xlu2 %v235_v11 }
 0x48e   :  { %v234_v16 = vpop.xlane.xlu1 %233 }
 0x48f   :  { %v238_v17 = vmul.f32 %v234_v16, %v634_v1 }
 0x491   :  { %v240_v18 = vadd.f32 1e-05, %v238_v17 }
 0x493   :  { %495 = vrsqrt.f32 %v240_v18  ;;  %vm248_vm4 = vweird.f32 %v240_v18 }
 0x496   :  { %v237_v22 = vpop.xlane.xlu2 %236 }
 0x497   :  { %v239_v23 = vmul.f32 %v237_v22, %v634_v1 }
 0x499   :  { %v496_v25 = vpop.eup %495  ;;  %v241_v26 = vadd.f32 1e-05, %v239_v23 }
 0x49a   :  { %v243_v28 = vmul.f32 %v496_v25, %v240_v18  ;;  %vm249_vm3 = vweird.f32 %v496_v25 }
 0x49b   :  { %497 = vrsqrt.f32 %v241_v26  ;;  %vm250_vm5 = vmor %vm248_vm4, %vm249_vm3  ;;  %vm258_vm7 = vweird.f32 %v241_v26 }
 0x49c   :  { %v244_v29 = vmul.f32 %v496_v25, %v243_v28 }
 0x49e   :  { %v245_v30 = vmul.f32 0.5, %v244_v29 }
 0x4a0   :  { %v246_v31 = vsub.f32 1.5, %v245_v30 }
 0x4a1   :  { %v498_v32 = vpop.eup %497 }
 0x4a2   :  { %v247_v33 = vmul.f32 %v496_v25, %v246_v31  ;;  %v253_v34 = vmul.f32 %v498_v32, %v241_v26  ;;  %vm259_vm6 = vweird.f32 %v498_v32 }
 0x4a3   :  { %vm260_vm8 = vmor %vm258_vm7, %vm259_vm6 }
 0x4a4   :  { %v251_v36 = vsel %vm250_vm5, %v496_v25, %v247_v33  ;;  %v254_v37 = vmul.f32 %v498_v32, %v253_v34 }
 0x4a5   :  { %v262_v38 = vmul.f32 %v251_v36, %v228_v4 }
 0x4a6   :  { %v255_v40 = vmul.f32 0.5, %v254_v37 }
 0x4a7   :  { %v265_v41 = vmul.f32 %v264_v35, %v262_v38 }
 0x4a8   :  { %v256_v42 = vsub.f32 1.5, %v255_v40 }
 0x4a9   :  { %v268_v43 = vadd.f32 %v267_v39, %v265_v41 }
 0x4aa   :  { %v257_v44 = vmul.f32 %v498_v32, %v256_v42 }
 0x4ab   :  { %462 = vmatmul.msk.f32.vlgmr.msrb.gmra.mxu2 %vm46_vm0, %v268_v43 }
 0x4ac   :  { %v261_v45 = vsel %vm260_vm8, %v498_v32, %v257_v44  ;;  %v394_v32 = vperm.slane %v627_v49, 4 }
 0x4ad   :  { %v263_v46 = vmul.f32 %v261_v45, %v639_v9 }
 0x4af   :  { %v266_v47 = vmul.f32 %v264_v35, %v263_v46 }
 0x4b1   :  { %v269_v48 = vadd.f32 %v267_v39, %v266_v47 }
 0x4b3   :  { %463 = vmatmul.msk.f32.gmra.mxu2 %vm46_vm0, %v269_v48 }
 0x52e   :  { %v301_v54 = vpop.f32.mrf.mxu2 }
 0x52f   :  { %v302_v55 = vadd.f32 %v484_v53, %v301_v54 }
 0x531   :  { %v307_v56 = vmax.f32 %v302_v55, 0.0 }
 0x533   :  { %464 = vmatmul.msk.f32.vlgmr.msrb.gmra.mxu0 %vm318_vm9, %v307_v56 }
 0x536   :  { %v304_v57 = vpop.f32.mrf.mxu2 }
 0x537   :  { %v305_v58 = vadd.f32 %v484_v53, %v304_v57 }
 0x539   :  { %v308_v59 = vmax.f32 %v305_v58, 0.0 }
 0x53b   :  { %465 = vmatmul.msk.f32.vlgmr.msrb.gmra.mxu3 %vm318_vm9, %v308_v59 }
 0x5b0   :  { %v342_v63 = vpop.f32.mrf.mxu0 }
 0x5b1   :  { %v343_v2 = vadd.f32 %v342_v63, %v317_v60 }
 0x5b3   :  { %v348_v4 = vadd.f32 %v343_v2, %v268_v43 }
 0x5b5   :  { %v350_v6 = vsel %vm46_vm0, %v348_v4, 0.0 }
 0x5be   :  { %v345_v61 = vpop.f32.mrf.mxu3 }
 0x5bf   :  { %v346_v62 = vadd.f32 %v345_v61, %v317_v60 }
 0x5c1   :  { %v349_v0 = vadd.f32 %v346_v62, %v269_v48 }
 0x5c3   :  { %v353_v3 = vsel %vm46_vm0, %v349_v0, 0.0 }
 0x5c4   :  { %354 = vadd.xlane.f32.xlu1 %v353_v3 }
 0x5cc   :  { %351 = vadd.xlane.f32.xlu1 %v350_v6 }
 0x637   :  { %v355_v5 = vpop.xlane.xlu1 %354 }
 0x638   :  { %v357_v7 = vmul.f32 %v355_v5, %v634_v1 }
 0x63a   :  { %v359_v8 = vsub.f32 %v349_v0, %v357_v7 }
 0x63c   :  { %v361_v9 = vmul.f32 %v359_v8, %v359_v8 }
 0x63e   :  { %v365_v10 = vsel %vm46_vm0, %v361_v9, 0.0 }
 0x63f   :  { %366 = vadd.xlane.f32.xlu1 %v365_v10  ;;  %v352_v11 = vpop.xlane.xlu1 %351 }
 0x640   :  { %v356_v12 = vmul.f32 %v352_v11, %v634_v1 }
 0x642   :  { %v358_v13 = vsub.f32 %v348_v4, %v356_v12 }
 0x644   :  { %v360_v14 = vmul.f32 %v358_v13, %v358_v13 }
 0x646   :  { %v362_v15 = vsel %vm46_vm0, %v360_v14, 0.0 }
 0x647   :  { %363 = vadd.xlane.f32.xlu0 %v362_v15  ;;  %425 = vadd.xlane.f32.xlu1 %v424_v20 }
 0x6b2   :  { %v367_v16 = vpop.xlane.xlu1 %366 }
 0x6b3   :  { %v369_v17 = vmul.f32 %v367_v16, %v634_v1 }
 0x6b5   :  { %v371_v18 = vadd.f32 1e-05, %v369_v17 }
 0x6b7   :  { %499 = vrsqrt.f32 %v371_v18  ;;  %vm388_vm11 = vweird.f32 %v371_v18 }
 0x6ba   :  { %v364_v21 = vpop.xlane.xlu0 %363  ;;  %v426_v45 = vpop.xlane.xlu1 %425 }
 0x6bb   :  { %v368_v22 = vmul.f32 %v364_v21, %v634_v1  ;;  %v397_v1 = vperm.slane %v627_v49, 5  ;;  %v427_v46 = vmax.f32 %v426_v45, 1e-09 }
 0x6bd   :  { %v500_v23 = vpop.eup %499  ;;  %v370_v24 = vadd.f32 1e-05, %v368_v22 }
 0x6be   :  { %v383_v25 = vmul.f32 %v500_v23, %v371_v18  ;;  %vm389_vm10 = vweird.f32 %v500_v23 }
 0x6bf   :  { %501 = vrsqrt.f32 %v370_v24  ;;  %vm390_vm12 = vmor %vm388_vm11, %vm389_vm10  ;;  %vm378_vm14 = vweird.f32 %v370_v24 }
 0x6c0   :  { %v384_v26 = vmul.f32 %v500_v23, %v383_v25  ;;  %503 = vrcp.f32 %v427_v46 }
 0x6c2   :  { %v385_v27 = vmul.f32 0.5, %v384_v26 }
 0x6c4   :  { %v386_v28 = vsub.f32 1.5, %v385_v27 }
 0x6c5   :  { %v502_v29 = vpop.eup %501 }
 0x6c6   :  { %v387_v30 = vmul.f32 %v500_v23, %v386_v28  ;;  %v373_v31 = vmul.f32 %v502_v29, %v370_v24  ;;  %vm379_vm13 = vweird.f32 %v502_v29  ;;  %v504_v49 = vpop.eup %503 }
 0x6c7   :  { %vm380_vm15 = vmor %vm378_vm14, %vm379_vm13 }
 0x6c8   :  { %v374_v33 = vmul.f32 %v502_v29, %v373_v31  ;;  %v391_v34 = vsel %vm390_vm12, %v500_v23, %v387_v30 }
 0x6c9   :  { %v393_v35 = vmul.f32 %v391_v34, %v359_v8 }
 0x6ca   :  { %v375_v36 = vmul.f32 0.5, %v374_v33 }
 0x6cb   :  { %v396_v37 = vmul.f32 %v394_v32, %v393_v35 }
 0x6cc   :  { %v376_v38 = vsub.f32 1.5, %v375_v36 }
 0x6cd   :  { %v399_v39 = vadd.f32 %v397_v1, %v396_v37 }
 0x6ce   :  { %v377_v40 = vmul.f32 %v502_v29, %v376_v38 }
 0x6cf   :  { %418 = vmatpush.msrb.mxu1 %v399_v39 }
 0x6d0   :  { %v381_v41 = vsel %vm380_vm15, %v502_v29, %v377_v40 }
 0x6d1   :  { %v392_v42 = vmul.f32 %v381_v41, %v358_v13 }
 0x6d3   :  { %v395_v43 = vmul.f32 %v394_v32, %v392_v42 }
 0x6d5   :  { %v398_v44 = vadd.f32 %v397_v1, %v395_v43 }
 0x6d7   :  { %419 = vmatpush.msrb.mxu1 %v398_v44 }
 0x6d8   :  { %466 = vmatmul.msk.f32.vlgmr.msrb.gmra.mxu1 %vm119_vm1, %v400_v19 }
 0x755   :  { %v421_v47 = vpop.f32.mrf.mxu1 }
 0x756   :  { %v429_v48 = vmul.f32 %v504_v49, %v421_v47 }
 0x758   :  { %v430_v50 = vmul.f32 %v429_v48, %v429_v48 }
 0x75a   :  { %v431_v51 = vsel %vm46_vm0, %v430_v50, 0.0 }
 0x75b   :  { %432 = vadd.xlane.f32.xlu0 %v431_v51 }
 0x7ce   :  { %v433_v52 = vpop.xlane.xlu0 %432 }
 0x7cf   :  { %v434_v53 = vmax.f32 %v433_v52, 1e-24 }
 0x7d1   :  { %505 = vrsqrt.f32 %v434_v53  ;;  %vm441_vm1 = vweird.f32 %v434_v53 }
 0x7d7   :  { %v506_v54 = vpop.eup %505 }
 0x7d8   :  { %v436_v55 = vmul.f32 %v506_v54, %v434_v53  ;;  %vm442_vm2 = vweird.f32 %v506_v54 }
 0x7d9   :  { %vm443_vm3 = vmor %vm441_vm1, %vm442_vm2 }
 0x7da   :  { %v437_v56 = vmul.f32 %v506_v54, %v436_v55 }
 0x7dc   :  { %v438_v57 = vmul.f32 0.5, %v437_v56 }
 0x7de   :  { %v439_v58 = vsub.f32 1.5, %v438_v57 }
 0x7e0   :  { %v440_v59 = vmul.f32 %v506_v54, %v439_v58 }
 0x7e2   :  { %v444_v60 = vsel %vm443_vm3, %v506_v54, %v440_v59 }
 0x7e3   :  { %v445_v61 = vmul.f32 %v444_v60, %v429_v48 }
 0x7e5   :  { %v446_v62 = vsel %vm46_vm0, %v445_v61, 0.0 }
 0x7e6   :  { %447 = vst [vmem:[%s721_s10] sm:$0xff] %v446_v62 }

</bundles_post_ra>
